<compile_context>
chip_gen: v5e
topology: v5e:2x2
jax: 0.10.0
libtpu: 0.0.40
codegen_flags: <defaults>
</compile_context>

<pallas_src>
import jax
import jax.numpy as jnp
from jax.experimental import pallas as pl
from jax.experimental.pallas import tpu as pltpu


def autoencoder_kernel(x_ref,
                       w1, b1, w2, b2, w3, b3,
                       w4, b4, w5, b5, w6, b6,
                       o_ref):
    """One batch tile.  Layout: features on sublanes, batch on lanes.

    x_ref / o_ref : (1, tm)    -- lane-dense input/output tiles (f32)
    wk            : (out, in)  -- PyTorch layout, so each layer is W @ h;
                                  w2..w5 may be bf16 (MXU operands)
    bk            : (out, 1)   -- f32, broadcast over the lane (batch) axis
    w1 / w6 are passed as (64, 1) columns so the degenerate K=1 / M=1 layers
    run on the VPU instead of wasting MXU pushes.
    """
    x = x_ref[...]                                          # (1, tm) f32

    # Layer 1: Linear(1, 64).  K=1 matmul == outer product -> pure VPU, f32.
    h = jnp.maximum(w1[...] * x + b1[...], 0.0)             # (64, tm)

    # Layers 2..5 on the MXU: (out,in) @ (in,tm), N = tm dense lanes.
    # Operands cast to the weight dtype (bf16 fast path / f32), f32 accumulate,
    # bias + ReLU stay f32.
    def lin_relu(w_ref, b_ref, h):
        y = jnp.dot(w_ref[...], h.astype(w_ref.dtype),
                    preferred_element_type=jnp.float32) + b_ref[...]
        return jnp.maximum(y, 0.0)

    h = lin_relu(w2, b2, h)                                 # (32, tm)
    h = lin_relu(w3, b3, h)                                 # (16, tm)
    h = lin_relu(w4, b4, h)                                 # (32, tm)
    h = lin_relu(w5, b5, h)                                 # (64, tm)
    # TODO(synk): if a bundle dump shows the MXU push slot saturated, the
    # 32->16 / 16->32 layers above could move to VPU mul + sublane reduce.

    # Layer 6: Linear(64, 1).  M=1 matmul -> VPU multiply + sublane reduce, f32.
    y = jnp.sum(w6[...] * h, axis=0, keepdims=True) + b6[...]   # (1, tm)
    o_ref[...] = y.astype(o_ref.dtype)


def _round_up(x, m):
    return ((x + m - 1) // m) * m


def _choose_tm(n, target_tm=8192):
    """Batch tile: lane-aligned (multiple of 256), big enough to amortize the
    per-grid-step overhead, but capped so the 'parallel' batch axis keeps
    >= 2 grid steps when the batch allows (v7x megacore)."""
    tm = min(target_tm, _round_up(pl.cdiv(n, 2), 256))
    return max(tm, 256)


def autoencoder_forward(x, params, *, tm=None, use_bf16=True):
    """x: (N, 1) float32.  params: 6 (W:(out,in), b:(out,)) tuples (PyTorch layout).

    use_bf16: run the four MXU layers with bf16 operands / f32 accumulation
    (recommended; layer 1/6, biases and ReLUs stay f32).
    """
    N, F = x.shape
    assert F == 1
    if tm is None:
        tm = _choose_tm(N)
    assert tm % 128 == 0, "batch tile must be lane-aligned (multiple of 128)"

    (w1, b1), (w2, b2), (w3, b3), (w4, b4), (w5, b5), (w6, b6) = params
    wdt = jnp.bfloat16 if use_bf16 else x.dtype
    # In a real deployment cast/reshape the params once up front; the arrays
    # total ~21 KiB so doing it per call is noise.
    ops = [
        w1.reshape(64, 1),  b1.reshape(64, 1),   # Linear(1, 64)   VPU
        w2.astype(wdt),     b2.reshape(32, 1),   # Linear(64, 32)  MXU
        w3.astype(wdt),     b3.reshape(16, 1),   # Linear(32, 16)  MXU
        w4.astype(wdt),     b4.reshape(32, 1),   # Linear(16, 32)  MXU
        w5.astype(wdt),     b5.reshape(64, 1),   # Linear(32, 64)  MXU
        w6.reshape(64, 1),  b6.reshape(1, 1),    # Linear(64, 1)   VPU
    ]
    # Full-array blocks with constant index_maps keep the params resident in
    # VMEM across every grid step (single DMA, no re-fetch).
    param_specs = [pl.BlockSpec(p.shape, lambda i: (0, 0)) for p in ops]

    # (N,1) <-> (1,N) reshapes are layout-preserving (no HBM pass); the grid
    # uses pl.cdiv so no pad/slice copies of x / out are needed.
    xr = x.reshape(1, N)
    grid = (pl.cdiv(N, tm),)

    flops = 2 * (1 * 64 + 64 * 32 + 32 * 16 + 16 * 32 + 32 * 64 + 64 * 1) * N
    param_bytes = sum(int(p.size) * p.dtype.itemsize for p in ops)
    bytes_accessed = 2 * 4 * N + param_bytes

    out = pl.pallas_call(
        autoencoder_kernel,
        out_shape=jax.ShapeDtypeStruct((1, N), x.dtype),
        grid_spec=pltpu.PrefetchScalarGridSpec(
            num_scalar_prefetch=0,
            grid=grid,
            in_specs=[pl.BlockSpec((1, tm), lambda i: (0, i))] + param_specs,
            out_specs=pl.BlockSpec((1, tm), lambda i: (0, i)),
        ),
        compiler_params=pltpu.CompilerParams(
            dimension_semantics=("parallel",),
            # Headroom above the 16/32 MiB scoped defaults for tm up to ~8192,
            # still well under v7x's 64 MiB physical VMEM.
            vmem_limit_bytes=48 * 1024 * 1024,
        ),
        cost_estimate=pl.CostEstimate(
            flops=flops, transcendentals=0, bytes_accessed=bytes_accessed),
    )(xr, *ops)

    return out.reshape(N, 1)


def init_params(key):
    """PyTorch nn.Linear default init: W:(out,in), b:(out,), U[-1/sqrt(in), 1/sqrt(in)]."""
    layer_dims = [(1, 64), (64, 32), (32, 16), (16, 32), (32, 64), (64, 1)]
    params = []
    for (fan_in, fan_out) in layer_dims:
        key, kw, kb = jax.random.split(key, 3)
        bound = 1.0 / (fan_in ** 0.5)
        w = jax.random.uniform(kw, (fan_out, fan_in), jnp.float32, -bound, bound)
        b = jax.random.uniform(kb, (fan_out,), jnp.float32, -bound, bound)
        params.append((w, b))
    return params


def reference_forward(x, params, *, use_bf16=False):
    """Pure-JAX reference.  With use_bf16=True it applies the same operand
    casts as the kernel's fast path (bf16 MXU layers, f32 accumulation)."""
    h = x
    last = len(params) - 1
    for idx, (w, b) in enumerate(params):
        if use_bf16 and 0 < idx < last:
            y = jnp.dot(h.astype(jnp.bfloat16), w.T.astype(jnp.bfloat16),
                        preferred_element_type=jnp.float32) + b
        else:
            y = jnp.dot(h, w.T, precision=jax.lax.Precision.HIGHEST) + b
        h = jnp.maximum(y, 0.0) if idx < last else y
    return h


if __name__ == "__main__":
    key = jax.random.PRNGKey(0)
    kx, kp = jax.random.split(key)

    # Forward implies input shape (N, 1).  N=1000 is not a tile multiple
    # (exercises the clipped edge-block path) and _choose_tm picks tm=512,
    # keeping a 2-step "parallel" grid for v7x's two TensorCores.
    N = 1000
    x = jax.random.normal(kx, (N, 1), jnp.float32)
    params = init_params(kp)

    # Default bf16-MXU path, checked against a reference with matching casts
    # (f32 accumulation) so the tolerance stays tight and meaningful.
    out_bf16 = jax.block_until_ready(autoencoder_forward(x, params))
    ref_bf16 = reference_forward(x, params, use_bf16=True)
    assert out_bf16.shape == (N, 1), out_bf16.shape
    err_bf16 = float(jnp.max(jnp.abs(out_bf16 - ref_bf16)))
    assert jnp.allclose(out_bf16, ref_bf16, atol=5e-3, rtol=5e-3), \
        f"bf16 path mismatch vs matched reference: {err_bf16}"

    # Full-f32 path vs HIGHEST-precision reference (tolerance relaxed to 1e-3
    # to be robust to Mosaic's default f32-matmul pass count across chips).
    out_f32 = jax.block_until_ready(
        autoencoder_forward(x, params, use_bf16=False))
    ref_f32 = reference_forward(x, params, use_bf16=False)
    err_f32 = float(jnp.max(jnp.abs(out_f32 - ref_f32)))
    assert jnp.allclose(out_f32, ref_f32, atol=1e-3, rtol=1e-3), \
        f"f32 path mismatch vs reference: {err_f32}"

    print("KERNEL_OK")
</pallas_src>

<mosaic_0001>
module attributes {stable_mosaic.version = 11 : i64} {
  func.func @autoencoder_kernel(%arg0: i32, %arg1: memref<1x512xf32, #tpu.memory_space<vmem>>, %arg2: memref<64x1xf32, #tpu.memory_space<vmem>>, %arg3: memref<64x1xf32, #tpu.memory_space<vmem>>, %arg4: memref<32x64xbf16, #tpu.memory_space<vmem>>, %arg5: memref<32x1xf32, #tpu.memory_space<vmem>>, %arg6: memref<16x32xbf16, #tpu.memory_space<vmem>>, %arg7: memref<16x1xf32, #tpu.memory_space<vmem>>, %arg8: memref<32x16xbf16, #tpu.memory_space<vmem>>, %arg9: memref<32x1xf32, #tpu.memory_space<vmem>>, %arg10: memref<64x32xbf16, #tpu.memory_space<vmem>>, %arg11: memref<64x1xf32, #tpu.memory_space<vmem>>, %arg12: memref<64x1xf32, #tpu.memory_space<vmem>>, %arg13: memref<1x1xf32, #tpu.memory_space<vmem>>, %arg14: memref<1x512xf32, #tpu.memory_space<vmem>>) attributes {dimension_semantics = [#tpu.dimension_semantics<parallel>], iteration_bounds = array<i64: 2>, scalar_prefetch = 0 : i64, scratch_operands = 0 : i64, tpu.core_type = #tpu.core_type<tc>, window_params = [{transform_indices = @transform_0, window_bounds = array<i64: 1, 512>}, {pipeline_mode = #tpu.pipeline_mode<synchronous>, transform_indices = @transform_1, window_bounds = array<i64: 64, 1>}, {pipeline_mode = #tpu.pipeline_mode<synchronous>, transform_indices = @transform_2, window_bounds = array<i64: 64, 1>}, {pipeline_mode = #tpu.pipeline_mode<synchronous>, transform_indices = @transform_3, window_bounds = array<i64: 32, 64>}, {pipeline_mode = #tpu.pipeline_mode<synchronous>, transform_indices = @transform_4, window_bounds = array<i64: 32, 1>}, {pipeline_mode = #tpu.pipeline_mode<synchronous>, transform_indices = @transform_5, window_bounds = array<i64: 16, 32>}, {pipeline_mode = #tpu.pipeline_mode<synchronous>, transform_indices = @transform_6, window_bounds = array<i64: 16, 1>}, {pipeline_mode = #tpu.pipeline_mode<synchronous>, transform_indices = @transform_7, window_bounds = array<i64: 32, 16>}, {pipeline_mode = #tpu.pipeline_mode<synchronous>, transform_indices = @transform_8, window_bounds = array<i64: 32, 1>}, {pipeline_mode = #tpu.pipeline_mode<synchronous>, transform_indices = @transform_9, window_bounds = array<i64: 64, 32>}, {pipeline_mode = #tpu.pipeline_mode<synchronous>, transform_indices = @transform_10, window_bounds = array<i64: 64, 1>}, {pipeline_mode = #tpu.pipeline_mode<synchronous>, transform_indices = @transform_11, window_bounds = array<i64: 64, 1>}, {pipeline_mode = #tpu.pipeline_mode<synchronous>, transform_indices = @transform_12, window_bounds = array<i64: 1, 1>}, {transform_indices = @transform_13, window_bounds = array<i64: 1, 512>}]} {
    %c0 = arith.constant 0 : index
    %c0_0 = arith.constant 0 : index
    %0 = vector.load %arg1[%c0, %c0_0] : memref<1x512xf32, #tpu.memory_space<vmem>>, vector<1x512xf32>
    %c0_1 = arith.constant 0 : index
    %c0_2 = arith.constant 0 : index
    %1 = vector.load %arg2[%c0_1, %c0_2] : memref<64x1xf32, #tpu.memory_space<vmem>>, vector<64x1xf32>
    %2 = vector.broadcast %1 : vector<64x1xf32> to vector<64x512xf32>
    %3 = vector.broadcast %0 : vector<1x512xf32> to vector<64x512xf32>
    %4 = arith.mulf %2, %3 : vector<64x512xf32>
    %c0_3 = arith.constant 0 : index
    %c0_4 = arith.constant 0 : index
    %5 = vector.load %arg3[%c0_3, %c0_4] : memref<64x1xf32, #tpu.memory_space<vmem>>, vector<64x1xf32>
    %6 = vector.broadcast %5 : vector<64x1xf32> to vector<64x512xf32>
    %7 = arith.addf %4, %6 : vector<64x512xf32>
    %cst = arith.constant 0.000000e+00 : f32
    %8 = vector.broadcast %cst : f32 to vector<64x512xf32>
    %9 = arith.maximumf %7, %8 : vector<64x512xf32>
    %c0_5 = arith.constant 0 : index
    %c0_6 = arith.constant 0 : index
    %10 = vector.load %arg4[%c0_5, %c0_6] : memref<32x64xbf16, #tpu.memory_space<vmem>>, vector<32x64xbf16>
    %11 = arith.truncf %9 : vector<64x512xf32> to vector<64x512xbf16>
    %cst_7 = arith.constant dense<0.000000e+00> : vector<32x512xf32>
    %12 = tpu.matmul %10, %11, %cst_7 {dimension_numbers = #tpu.dot_dimension_numbers<[1], [0], [0], [1], [0, 0, 1, 1], [], []>} : vector<32x64xbf16>, vector<64x512xbf16>, vector<32x512xf32> -> vector<32x512xf32>
    %c0_8 = arith.constant 0 : index
    %c0_9 = arith.constant 0 : index
    %13 = vector.load %arg5[%c0_8, %c0_9] : memref<32x1xf32, #tpu.memory_space<vmem>>, vector<32x1xf32>
    %14 = vector.broadcast %13 : vector<32x1xf32> to vector<32x512xf32>
    %15 = arith.addf %12, %14 : vector<32x512xf32>
    %cst_10 = arith.constant 0.000000e+00 : f32
    %16 = vector.broadcast %cst_10 : f32 to vector<32x512xf32>
    %17 = arith.maximumf %15, %16 : vector<32x512xf32>
    %c0_11 = arith.constant 0 : index
    %c0_12 = arith.constant 0 : index
    %18 = vector.load %arg6[%c0_11, %c0_12] : memref<16x32xbf16, #tpu.memory_space<vmem>>, vector<16x32xbf16>
    %19 = arith.truncf %17 : vector<32x512xf32> to vector<32x512xbf16>
    %cst_13 = arith.constant dense<0.000000e+00> : vector<16x512xf32>
    %20 = tpu.matmul %18, %19, %cst_13 {dimension_numbers = #tpu.dot_dimension_numbers<[1], [0], [0], [1], [0, 0, 1, 1], [], []>} : vector<16x32xbf16>, vector<32x512xbf16>, vector<16x512xf32> -> vector<16x512xf32>
    %c0_14 = arith.constant 0 : index
    %c0_15 = arith.constant 0 : index
    %21 = vector.load %arg7[%c0_14, %c0_15] : memref<16x1xf32, #tpu.memory_space<vmem>>, vector<16x1xf32>
    %22 = vector.broadcast %21 : vector<16x1xf32> to vector<16x512xf32>
    %23 = arith.addf %20, %22 : vector<16x512xf32>
    %cst_16 = arith.constant 0.000000e+00 : f32
    %24 = vector.broadcast %cst_16 : f32 to vector<16x512xf32>
    %25 = arith.maximumf %23, %24 : vector<16x512xf32>
    %c0_17 = arith.constant 0 : index
    %c0_18 = arith.constant 0 : index
    %26 = vector.load %arg8[%c0_17, %c0_18] : memref<32x16xbf16, #tpu.memory_space<vmem>>, vector<32x16xbf16>
    %27 = arith.truncf %25 : vector<16x512xf32> to vector<16x512xbf16>
    %cst_19 = arith.constant dense<0.000000e+00> : vector<32x512xf32>
    %28 = tpu.matmul %26, %27, %cst_19 {dimension_numbers = #tpu.dot_dimension_numbers<[1], [0], [0], [1], [0, 0, 1, 1], [], []>} : vector<32x16xbf16>, vector<16x512xbf16>, vector<32x512xf32> -> vector<32x512xf32>
    %c0_20 = arith.constant 0 : index
    %c0_21 = arith.constant 0 : index
    %29 = vector.load %arg9[%c0_20, %c0_21] : memref<32x1xf32, #tpu.memory_space<vmem>>, vector<32x1xf32>
    %30 = vector.broadcast %29 : vector<32x1xf32> to vector<32x512xf32>
    %31 = arith.addf %28, %30 : vector<32x512xf32>
    %cst_22 = arith.constant 0.000000e+00 : f32
    %32 = vector.broadcast %cst_22 : f32 to vector<32x512xf32>
    %33 = arith.maximumf %31, %32 : vector<32x512xf32>
    %c0_23 = arith.constant 0 : index
    %c0_24 = arith.constant 0 : index
    %34 = vector.load %arg10[%c0_23, %c0_24] : memref<64x32xbf16, #tpu.memory_space<vmem>>, vector<64x32xbf16>
    %35 = arith.truncf %33 : vector<32x512xf32> to vector<32x512xbf16>
    %cst_25 = arith.constant dense<0.000000e+00> : vector<64x512xf32>
    %36 = tpu.matmul %34, %35, %cst_25 {dimension_numbers = #tpu.dot_dimension_numbers<[1], [0], [0], [1], [0, 0, 1, 1], [], []>} : vector<64x32xbf16>, vector<32x512xbf16>, vector<64x512xf32> -> vector<64x512xf32>
    %c0_26 = arith.constant 0 : index
    %c0_27 = arith.constant 0 : index
    %37 = vector.load %arg11[%c0_26, %c0_27] : memref<64x1xf32, #tpu.memory_space<vmem>>, vector<64x1xf32>
    %38 = vector.broadcast %37 : vector<64x1xf32> to vector<64x512xf32>
    %39 = arith.addf %36, %38 : vector<64x512xf32>
    %cst_28 = arith.constant 0.000000e+00 : f32
    %40 = vector.broadcast %cst_28 : f32 to vector<64x512xf32>
    %41 = arith.maximumf %39, %40 : vector<64x512xf32>
    %c0_29 = arith.constant 0 : index
    %c0_30 = arith.constant 0 : index
    %42 = vector.load %arg12[%c0_29, %c0_30] : memref<64x1xf32, #tpu.memory_space<vmem>>, vector<64x1xf32>
    %43 = vector.broadcast %42 : vector<64x1xf32> to vector<64x512xf32>
    %44 = arith.mulf %43, %41 : vector<64x512xf32>
    %cst_31 = arith.constant dense<0.000000e+00> : vector<512xf32>
    %45 = vector.multi_reduction <add>, %44, %cst_31 [0] : vector<64x512xf32> to vector<512xf32>
    %46 = vector.shape_cast %45 : vector<512xf32> to vector<1x512xf32>
    %c0_32 = arith.constant 0 : index
    %c0_33 = arith.constant 0 : index
    %47 = vector.load %arg13[%c0_32, %c0_33] : memref<1x1xf32, #tpu.memory_space<vmem>>, vector<1x1xf32>
    %48 = vector.broadcast %47 : vector<1x1xf32> to vector<1x512xf32>
    %49 = arith.addf %46, %48 : vector<1x512xf32>
    %c0_34 = arith.constant 0 : index
    %c0_35 = arith.constant 0 : index
    %50 = vector.load %arg14[%c0_34, %c0_35] : memref<1x512xf32, #tpu.memory_space<vmem>>, vector<1x512xf32>
    tpu.vector_store %arg14[%c0_34, %c0_35], %49 {strides = array<i32>} : memref<1x512xf32, #tpu.memory_space<vmem>>, vector<1x512xf32>,
    return
  }
  func.func @transform_0(%arg0: i32) -> (i32, i32) {
    %c0_i32 = arith.constant 0 : i32
    %c0_i32_0 = arith.constant 0 : i32
    return %c0_i32, %arg0 : i32, i32
  }
  func.func @transform_1(%arg0: i32) -> (i32, i32) {
    %c0_i32 = arith.constant 0 : i32
    %c0_i32_0 = arith.constant 0 : i32
    %c0_i32_1 = arith.constant 0 : i32
    return %c0_i32, %c0_i32_0 : i32, i32
  }
  func.func @transform_2(%arg0: i32) -> (i32, i32) {
    %c0_i32 = arith.constant 0 : i32
    %c0_i32_0 = arith.constant 0 : i32
    %c0_i32_1 = arith.constant 0 : i32
    return %c0_i32, %c0_i32_0 : i32, i32
  }
  func.func @transform_3(%arg0: i32) -> (i32, i32) {
    %c0_i32 = arith.constant 0 : i32
    %c0_i32_0 = arith.constant 0 : i32
    %c0_i32_1 = arith.constant 0 : i32
    return %c0_i32, %c0_i32_0 : i32, i32
  }
  func.func @transform_4(%arg0: i32) -> (i32, i32) {
    %c0_i32 = arith.constant 0 : i32
    %c0_i32_0 = arith.constant 0 : i32
    %c0_i32_1 = arith.constant 0 : i32
    return %c0_i32, %c0_i32_0 : i32, i32
  }
  func.func @transform_5(%arg0: i32) -> (i32, i32) {
    %c0_i32 = arith.constant 0 : i32
    %c0_i32_0 = arith.constant 0 : i32
    %c0_i32_1 = arith.constant 0 : i32
    return %c0_i32, %c0_i32_0 : i32, i32
  }
  func.func @transform_6(%arg0: i32) -> (i32, i32) {
    %c0_i32 = arith.constant 0 : i32
    %c0_i32_0 = arith.constant 0 : i32
    %c0_i32_1 = arith.constant 0 : i32
    return %c0_i32, %c0_i32_0 : i32, i32
  }
  func.func @transform_7(%arg0: i32) -> (i32, i32) {
    %c0_i32 = arith.constant 0 : i32
    %c0_i32_0 = arith.constant 0 : i32
    %c0_i32_1 = arith.constant 0 : i32
    return %c0_i32, %c0_i32_0 : i32, i32
  }
  func.func @transform_8(%arg0: i32) -> (i32, i32) {
    %c0_i32 = arith.constant 0 : i32
    %c0_i32_0 = arith.constant 0 : i32
    %c0_i32_1 = arith.constant 0 : i32
    return %c0_i32, %c0_i32_0 : i32, i32
  }
  func.func @transform_9(%arg0: i32) -> (i32, i32) {
    %c0_i32 = arith.constant 0 : i32
    %c0_i32_0 = arith.constant 0 : i32
    %c0_i32_1 = arith.constant 0 : i32
    return %c0_i32, %c0_i32_0 : i32, i32
  }
  func.func @transform_10(%arg0: i32) -> (i32, i32) {
    %c0_i32 = arith.constant 0 : i32
    %c0_i32_0 = arith.constant 0 : i32
    %c0_i32_1 = arith.constant 0 : i32
    return %c0_i32, %c0_i32_0 : i32, i32
  }
  func.func @transform_11(%arg0: i32) -> (i32, i32) {
    %c0_i32 = arith.constant 0 : i32
    %c0_i32_0 = arith.constant 0 : i32
    %c0_i32_1 = arith.constant 0 : i32
    return %c0_i32, %c0_i32_0 : i32, i32
  }
  func.func @transform_12(%arg0: i32) -> (i32, i32) {
    %c0_i32 = arith.constant 0 : i32
    %c0_i32_0 = arith.constant 0 : i32
    %c0_i32_1 = arith.constant 0 : i32
    return %c0_i32, %c0_i32_0 : i32, i32
  }
  func.func @transform_13(%arg0: i32) -> (i32, i32) {
    %c0_i32 = arith.constant 0 : i32
    %c0_i32_0 = arith.constant 0 : i32
    return %c0_i32, %arg0 : i32, i32
  }
}

</mosaic_0001>

<bundles_post_ra>
// kernel: tpu_custom_call.1
= control target key start
LH: loop header
LB: loop body
LE: loop exit
PB: predicated region body
PF: predicated region fallthrough
CT: control target
= control target key end

     0   :  { %s2216_s0 = inlined_call_operand.vmem [shape: f32[1,1000], index: 0, kind: input, shape index: {}]   ;;  %s2217_s1 = inlined_call_operand.vmem [shape: f32[64,1], index: 1, kind: input, shape index: {}]   ;;  %s2218_s2 = inlined_call_operand.vmem [shape: f32[64,1], index: 2, kind: input, shape index: {}]   ;;  %s2219_s3 = inlined_call_operand.vmem [shape: bf16[32,64], index: 3, kind: input, shape index: {}]   ;;  %s2220_s4 = inlined_call_operand.vmem [shape: f32[32,1], index: 4, kind: input, shape index: {}]   ;;  %s2221_s5 = inlined_call_operand.vmem [shape: bf16[16,32], index: 5, kind: input, shape index: {}]   ;;  %s2222_s6 = inlined_call_operand.vmem [shape: f32[16,1], index: 6, kind: input, shape index: {}]   ;;  %s2223_s7 = inlined_call_operand.vmem [shape: bf16[32,16], index: 7, kind: input, shape index: {}]   ;;  %s2224_s8 = inlined_call_operand.vmem [shape: f32[32,1], index: 8, kind: input, shape index: {}]   ;;  %s2225_s9 = inlined_call_operand.vmem [shape: bf16[64,32], index: 9, kind: input, shape index: {}]   ;;  %s2226_s10 = inlined_call_operand.vmem [shape: f32[64,1], index: 10, kind: input, shape index: {}]   ;;  %s2227_s11 = inlined_call_operand.vmem [shape: f32[64,1], index: 11, kind: input, shape index: {}]   ;;  %s2228_s12 = inlined_call_operand.<no memory space> [shape: f32[1,1], index: 12, kind: input, shape index: {}]   ;;  %s2229_s13 = inlined_call_operand.hbm [shape: f32[1,1000], index: 13, kind: output, shape index: {}]  }
   0x1   :  { %2231 = sst [smem:[#allocation6_spill]] %s2216_s0  ;;  %v18_v0 = vstv %s2228_s12 }
   0x2   :  { %2232 = sst [smem:[#allocation7_spill]] %s2217_s1  ;;  %19 = vst [vmem:[#allocation2] sm:$0x1] %v18_v0 }
   0x3   :  { %20 = vsyncpa [#allocation4], 0 }
   0x4   :  { %22 = vsyncpa [#allocation4 + $0x1], 0  ;;  %s1783_s27 = smov 0   ;;  %s1785_s28 = smov 0  }
   0x5   :  { %s1787_s29 = smov 0   ;;  %s1789_s30 = smov 0  }
   0x6 LB: > { %s2230_s12 = sadd.s32 4294967295, %s1707_s30   ;;  %s1511_s14 = sadd.s32 4294967294, %s1707_s30   ;;  %s1707_s30 = sphi %s1789_s30, %s2241_s30   ;;  %s1703_s29 = sphi %s1787_s29, %s2240_s29   ;;  %s1699_s28 = sphi %s1785_s28, %s2239_s28   ;;  %s1695_s27 = sphi %s1783_s27, %s2238_s27  }
   0x7   : > { %s1806_s15 = sadd.s32 1, %s1707_s30   ;;  %s313_s16 = sadd.s32 1, %s1703_s29 }
   0x8   : > { %s310_s17 = ssub.s32 %s1707_s30, %s1806_s15  ;;  %p323_p0 = scmp.ne.s32.totalorder %s1703_s29, %s1699_s28 }
   0x9   : > { %p311_p1 = scmp.eq.s32.totalorder %s310_s17, 0  ;;  %p324_p2 = scmp.eq.s32.totalorder %s2230_s12, 1 }
   0xa   : > { %p329_p3 = scmp.ne.s32.totalorder %s1699_s28, %s1695_s27  ;;  %p330_p4 = scmp.eq.s32.totalorder %s1511_s14, 1 }
   0xb   : > { %s1818_s18 = scalar_select %p311_p1, %s1703_s29, %s313_s16  }
   0xc   : > { %p1820_p5 = por %p324_p2, %p323_p0  ;;  %p1824_p6 = por %p330_p4, %p329_p3 }
   0xd   : > { %p1514_p7 = scmp.ge.s32.totalorder %s1707_s30, 1  ;;  %p392_p8 = scmp.lt.s32.totalorder %s1707_s30, 3 }
   0xf   : > { %p393_p9 = pnand %p1514_p7, %p392_p8 }
  0x10   : > { %s2235_s1 = sld [smem:[#allocation7_spill]] (!%p393_p9)  ;;  %s2236_s17 = sadd.s32 (!%p393_p9), 4294967295, %s1707_s30  }
  0x11   : > { %396 = sbr.rel (%p393_p9) target bundleno = 895 (0x37f), region = 72  ;;  %s1949_s21 = sshll.u32 (!%p393_p9), %s2236_s17, 2 }
  0x12   : > { %p436_p10 = scmp.lt.s32.totalorder (!%p393_p9), %s1949_s21, 7  ;;  %s2237_s0 = sld [smem:[#allocation6_spill]] (!%p393_p9) }
  0x13   : > { %s432_s16 = sand.u32 (!%p393_p9), 1, %s1699_s28   ;;  %s1450_s23 = scalar_lea.hbm (!%p393_p9), %s2229_s13, %s1949_s21 }
  0x14   : > { %s1515_s17 = sshll.u32 (!%p393_p9), %s432_s16, 2  ;;  %s1454_s12 = sshll.u32 (!%p393_p9), %s1450_s23, 4  ;;  %s1455_s12 = int_to_ptr.hbm [resolvable:$true] %s1454_s12 }
  0x15   : > { %s434_s24 = scalar_lea.vmem (!%p393_p9), [#allocation3], %s1515_s17  ;;  %s1659_s26 = sshra.s32 (!%p393_p9), %s1455_s12, 4  ;;  %s1660_s26 = int_to_ptr.hbm [resolvable:$true] %s1659_s26 }
  0x16   : > { %v538_v1 = vld [vmem:[%s2218_s2 + $0x30] sm:$0xff]  ;;  %v447_v3 = vld [vmem:[%s2235_s1 + $0x20] sm:$0xff]  ;;  %v1709_v4 = vmov 0   ;;  %v539_v5 = vld [vmem:[%s2218_s2 + $0x38] sm:$0xff]  ;;  %s437_s14 = scalar_select %p436_p10, %s1949_s21, 7  ;;  %vm698_vm0 = vcmask 523264  }
  0x17   : > { %v449_v2 = vld [vmem:[%s2235_s1 + $0x30] sm:$0xff]  ;;  %1644 = vset.pattern.permute.xlu2 %v1709_v4  ;;  %1643 = vset.pattern.permute.xlu1 %v1709_v4  ;;  %v450_v6 = vld [vmem:[%s2235_s1 + $0x38] sm:$0xff]  ;;  %v448_v7 = vld [vmem:[%s2235_s1 + $0x28] sm:$0xff]  ;;  %vm824_vm1 = vcmask 261120   ;;  %vm934_vm2 = vcmask 130048   ;;  %vm1427_vm3 = vcmask 1040384   ;;  %p1666_p0 = scmp.lt.s32.totalorder %s1660_s26, %s2229_s13 }
  0x18   : > { %1642 = vset.pattern.permute.xlu0 %v1709_v4  ;;  %572 = vperm.xlu1 %1643, %v538_v1   ;;  %v537_v8 = vld [vmem:[%s2218_s2 + $0x28] sm:$0xff]  ;;  %v536_v9 = vld [vmem:[%s2218_s2 + $0x20] sm:$0xff]  ;;  %v445_v10 = vld [vmem:[%s2235_s1 + $0x10] sm:$0xff]  ;;  %vm1429_vm4 = vcmask 1042434   ;;  %s1452_s25 = sshll.u32 %s434_s24, 4  ;;  %vm1431_vm5 = vcmask 1041408   ;;  %s1453_s25 = int_to_ptr.vmem [resolvable:$true] %s1452_s25 }
  0x19   : > { %483 = vperm.xlu0 %1642, %v449_v2   ;;  %473 = vperm.xlu2 %1644, %v447_v3   ;;  %v534_v11 = vld [vmem:[%s2218_s2 + $0x10] sm:$0xff]  ;;  %v446_v12 = vld [vmem:[%s2235_s1 + $0x18] sm:$0xff]  ;;  %v444_v14 = vld [vmem:[%s2235_s1 + $0x8] sm:$0xff]  ;;  %s1440_s21 = scalar_lea.sflag [#allocation4], %s432_s16  ;;  %s1665_s22 = scalar_lea.hbm %s2229_s13, 8 }
  0x1a   : > { %v535_v13 = vld [vmem:[%s2218_s2 + $0x18] sm:$0xff]  ;;  %v532_v15 = vld [vmem:[%s2218_s2] sm:$0xff]  ;;  %v666_v17 = vld [vmem:[%s2220_s4 + $0x10] sm:$0xff] }
  0x1b   : > { %v443_v16 = vld [vmem:[%s2235_s1] sm:$0xff]  ;;  %v667_v18 = vld [vmem:[%s2220_s4 + $0x18] sm:$0xff]  ;;  %v533_v19 = vld [vmem:[%s2218_s2 + $0x8] sm:$0xff]  ;;  %s438_s1 = scalar_lea.vmem %s2237_s0, %s437_s14  ;;  %s1661_s14 = scalar_lea.hbm %s1660_s26, 4 }
  0x1c   : > { %v665_v20 = vld [vmem:[%s2220_s4 + $0x8] sm:$0xff]  ;;  %v807_v21 = vld [vmem:[%s2222_s6] sm:$0xff]  ;;  %v902_v23 = vld [vmem:[%s2224_s8 + $0x10] sm:$0xff]  ;;  %p1662_p11 = scmp.ne.s32.totalorder %s1660_s26, %s1661_s14  ;;  %p1667_p1 = scmp.lt.s32.totalorder %s1665_s22, %s1661_s14 }
  0x1d   : > { %v664_v22 = vld [vmem:[%s2220_s4] sm:$0xff]  ;;  %v903_v24 = vld [vmem:[%s2224_s8 + $0x18] sm:$0xff]  ;;  %v808_v25 = vld [vmem:[%s2222_s6 + $0x8] sm:$0xff] }
  0x1e   : > { %v901_v26 = vld [vmem:[%s2224_s8 + $0x8] sm:$0xff]  ;;  %v1049_v27 = vld [vmem:[%s2226_s10] sm:$0xff]  ;;  %v1051_v29 = vld [vmem:[%s2226_s10 + $0x10] sm:$0xff]  ;;  %p1663_p12 = pnand %p1662_p11, %p1820_p5  ;;  %p1668_p2 = por %p1667_p1, %p1666_p0 }
  0x1f   : > { %v900_v28 = vld [vmem:[%s2224_s8] sm:$0xff]  ;;  %v1052_v30 = vld [vmem:[%s2226_s10 + $0x18] sm:$0xff]  ;;  %v1050_v31 = vld [vmem:[%s2226_s10 + $0x8] sm:$0xff] }
  0x20   : > { %577 = vperm.xlu1 %1643, %v539_v5   ;;  %v1277_v32 = vld [vmem:[%s2227_s11] sm:$0xff]  ;;  %v1278_v33 = vld [vmem:[%s2227_s11 + $0x8] sm:$0xff]  ;;  %v1280_v36 = vld [vmem:[%s2227_s11 + $0x18] sm:$0xff]  ;;  %p1664_p13 = pneg %p1663_p12 }
  0x21   : > { %488 = vperm.xlu0 %1642, %v450_v6   ;;  %478 = vperm.xlu2 %1644, %v448_v7   ;;  %v1053_v34 = vld [vmem:[%s2226_s10 + $0x20] sm:$0xff]  ;;  %v1054_v35 = vld [vmem:[%s2226_s10 + $0x28] sm:$0xff]  ;;  %v1279_v37 = vld [vmem:[%s2227_s11 + $0x10] sm:$0xff] }
  0x22   : > { %v1281_v38 = vld [vmem:[%s2227_s11 + $0x20] sm:$0xff]  ;;  %v1056_v39 = vld [vmem:[%s2226_s10 + $0x38] sm:$0xff]  ;;  %v1055_v40 = vld [vmem:[%s2226_s10 + $0x30] sm:$0xff]  ;;  %p1669_p3 = pnand %p1668_p2, %p1664_p13 }
  0x23   : > { %v1283_v41 = vld [vmem:[%s2227_s11 + $0x30] sm:$0xff]  ;;  %v1284_v42 = vld [vmem:[%s2227_s11 + $0x38] sm:$0xff]  ;;  %v1282_v43 = vld [vmem:[%s2227_s11 + $0x28] sm:$0xff] }
  0x24   : > { %v1409_v44 = vld [vmem:[#allocation2] sm:$0x1] }
  0x25   : > { %v442_v46 = vld [vmem:[%s438_s1] sm:$0xf] }
  0x26   : > { %v1965_v48 = vperm.slane %v442_v46, 0  ;;  %v1967_v49 = vperm.slane %v442_v46, 1  ;;  %v1969_v50 = vperm.slane %v442_v46, 2  ;;  %v1971_v51 = vperm.slane %v442_v46, 3 }
  0x28   : > { %567 = vperm.xlu1 %1643, %v537_v8  }
  0x29   : > { %562 = vperm.xlu0 %1642, %v536_v9   ;;  %463 = vperm.xlu2 %1644, %v445_v10  }
  0x30   : > { %552 = vperm.xlu1 %1643, %v534_v11  }
  0x31   : > { %468 = vperm.xlu0 %1642, %v446_v12   ;;  %557 = vperm.xlu2 %1644, %v535_v13  }
  0x38   : > { %458 = vperm.xlu1 %1643, %v444_v14  }
  0x39   : > { %542 = vperm.xlu2 %1644, %v532_v15   ;;  %453 = vperm.xlu0 %1642, %v443_v16  }
  0x40   : > { %680 = vperm.xlu1 %1643, %v666_v17  }
  0x41   : > { %685 = vperm.xlu2 %1644, %v667_v18   ;;  %547 = vperm.xlu0 %1642, %v533_v19  }
  0x48   : > { %675 = vperm.xlu1 %1643, %v665_v20  }
  0x49   : > { %811 = vperm.xlu2 %1644, %v807_v21   ;;  %670 = vperm.xlu0 %1642, %v664_v22  }
  0x50   : > { %916 = vperm.xlu1 %1643, %v902_v23  }
  0x51   : > { %921 = vperm.xlu2 %1644, %v903_v24   ;;  %816 = vperm.xlu0 %1642, %v808_v25  }
  0x58   : > { %911 = vperm.xlu1 %1643, %v901_v26  }
  0x59   : > { %1059 = vperm.xlu2 %1644, %v1049_v27   ;;  %906 = vperm.xlu0 %1642, %v900_v28  }
  0x60   : > { %1069 = vperm.xlu1 %1643, %v1051_v29  }
  0x61   : > { %1074 = vperm.xlu2 %1644, %v1052_v30   ;;  %1064 = vperm.xlu0 %1642, %v1050_v31  }
  0x68   : > { %1287 = vperm.xlu1 %1643, %v1277_v32  }
  0x69   : > { %1292 = vperm.xlu2 %1644, %v1278_v33   ;;  %1079 = vperm.xlu0 %1642, %v1053_v34  }
  0x70   : > { %1084 = vperm.xlu1 %1643, %v1054_v35  }
  0x71   : > { %1302 = vperm.xlu2 %1644, %v1280_v36   ;;  %1297 = vperm.xlu0 %1642, %v1279_v37  }
  0x73   : > { %v474_v45 = vpop.permute.xlu2 %473 }
  0x74   : > { %v516_v4 = vmul.f32 %v1965_v48, %v474_v45  ;;  %v517_v5 = vmul.f32 %v1967_v49, %v474_v45  ;;  %v518_v6 = vmul.f32 %v1969_v50, %v474_v45  ;;  %v519_v7 = vmul.f32 %v1971_v51, %v474_v45 }
  0x78   : > { %1307 = vperm.xlu1 %1643, %v1281_v38  }
  0x79   : > { %1094 = vperm.xlu2 %1644, %v1056_v39   ;;  %1089 = vperm.xlu0 %1642, %v1055_v40  }
  0x7b   : > { %v479_v57 = vpop.permute.xlu2 %478 }
  0x7c   : > { %v520_v20 = vmul.f32 %v1965_v48, %v479_v57  ;;  %v521_v21 = vmul.f32 %v1967_v49, %v479_v57  ;;  %v522_v22 = vmul.f32 %v1969_v50, %v479_v57  ;;  %v523_v23 = vmul.f32 %v1971_v51, %v479_v57 }
  0x80   : > { %1317 = vperm.xlu1 %1643, %v1283_v41  }
  0x81   : > { %1322 = vperm.xlu2 %1644, %v1284_v42   ;;  %1312 = vperm.xlu0 %1642, %v1282_v43  }
  0x83   : > { %v464_v29 = vpop.permute.xlu2 %463 }
  0x89   : > { %1412 = vperm.xlu0 %1642, %v1409_v44  }
  0x8a   : > { %v573_v47 = vpop.permute.xlu1 %572 }
  0x8b   : > { %v484_v52 = vpop.permute.xlu0 %483 }
  0x8c   : > { %v524_v53 = vmul.f32 %v1965_v48, %v484_v52  ;;  %v525_v54 = vmul.f32 %v1967_v49, %v484_v52  ;;  %v526_v55 = vmul.f32 %v1969_v50, %v484_v52  ;;  %v527_v56 = vmul.f32 %v1971_v51, %v484_v52 }
  0x8e   : > { %v604_v60 = vadd.f32 %v573_v47, %v524_v53  ;;  %v605_v61 = vadd.f32 %v573_v47, %v525_v54  ;;  %v606_v62 = vadd.f32 %v573_v47, %v526_v55  ;;  %v607_v63 = vadd.f32 %v573_v47, %v527_v56 }
  0x8f   : > { %v508_v54 = vmul.f32 %v1965_v48, %v464_v29  ;;  %v509_v55 = vmul.f32 %v1967_v49, %v464_v29  ;;  %v510_v56 = vmul.f32 %v1969_v50, %v464_v29 }
  0x90   : > { %v636_v12 = vmax.f32 %v604_v60, 0.0  ;;  %v637_v13 = vmax.f32 %v605_v61, 0.0  ;;  %v638_v14 = vmax.f32 %v606_v62, 0.0  ;;  %v639_v15 = vmax.f32 %v607_v63, 0.0 }
  0x92   : > { %v578_v58 = vpop.permute.xlu1 %577 }
  0x93   : > { %v489_v59 = vpop.permute.xlu0 %488 }
  0x94   : > { %v528_v0 = vmul.f32 %v1965_v48, %v489_v59  ;;  %v529_v1 = vmul.f32 %v1967_v49, %v489_v59  ;;  %v530_v2 = vmul.f32 %v1969_v50, %v489_v59  ;;  %v531_v3 = vmul.f32 %v1971_v51, %v489_v59 }
  0x96   : > { %v608_v8 = vadd.f32 %v578_v58, %v528_v0  ;;  %v609_v9 = vadd.f32 %v578_v58, %v529_v1  ;;  %v610_v10 = vadd.f32 %v578_v58, %v530_v2  ;;  %v611_v11 = vadd.f32 %v578_v58, %v531_v3 }
  0x97   : > { %v511_v58 = vmul.f32 %v1971_v51, %v464_v29 }
  0x98   : > { %v640_v16 = vmax.f32 %v608_v8, 0.0  ;;  %v641_v17 = vmax.f32 %v609_v9, 0.0  ;;  %v642_v18 = vmax.f32 %v610_v10, 0.0  ;;  %v643_v19 = vmax.f32 %v611_v11, 0.0 }
  0x9a   : > { %v568_v24 = vpop.permute.xlu1 %567  ;;  %v660_v25 = vpack.c.bf16 %v640_v16, %v636_v12  ;;  %v661_v26 = vpack.c.bf16 %v641_v17, %v637_v13  ;;  %v662_v27 = vpack.c.bf16 %v642_v18, %v638_v14  ;;  %v663_v28 = vpack.c.bf16 %v643_v19, %v639_v15 }
  0x9b   : > { %v563_v30 = vpop.permute.xlu0 %562  ;;  %v600_v31 = vadd.f32 %v568_v24, %v520_v20  ;;  %v601_v32 = vadd.f32 %v568_v24, %v521_v21  ;;  %v602_v33 = vadd.f32 %v568_v24, %v522_v22  ;;  %v603_v34 = vadd.f32 %v568_v24, %v523_v23 }
  0x9c   : > { %709 = vmatpush.bf16.msra.mxu0 %v660_v25  ;;  %728 = vmatpush.bf16.msra.mxu1 %v661_v26  ;;  %v596_v35 = vadd.f32 %v563_v30, %v516_v4  ;;  %v597_v36 = vadd.f32 %v563_v30, %v517_v5  ;;  %v598_v37 = vadd.f32 %v563_v30, %v518_v6  ;;  %v558_v4 = vpop.permute.xlu2 %557 }
  0x9d   : > { %747 = vmatpush.bf16.msra.mxu2 %v662_v27  ;;  %766 = vmatpush.bf16.msra.mxu3 %v663_v28  ;;  %v632_v38 = vmax.f32 %v600_v31, 0.0  ;;  %v633_v39 = vmax.f32 %v601_v32, 0.0  ;;  %v634_v40 = vmax.f32 %v602_v33, 0.0  ;;  %v599_v41 = vadd.f32 %v563_v30, %v519_v7 }
  0x9e   : > { %v628_v42 = vmax.f32 %v596_v35, 0.0  ;;  %v629_v43 = vmax.f32 %v597_v36, 0.0  ;;  %v630_v44 = vmax.f32 %v598_v37, 0.0  ;;  %v635_v45 = vmax.f32 %v603_v34, 0.0 }
  0x9f   : > { %v631_v46 = vmax.f32 %v599_v41, 0.0 }
  0xa0   : > { %v656_v47 = vpack.c.bf16 %v632_v38, %v628_v42  ;;  %v657_v52 = vpack.c.bf16 %v633_v39, %v629_v43  ;;  %v658_v53 = vpack.c.bf16 %v634_v40, %v630_v44 }
  0xa1   : > { %v659_v57 = vpack.c.bf16 %v635_v45, %v631_v46 }
  0xa2   : > { %710 = vmatpush.bf16.msra.mxu0 %v656_v47  ;;  %729 = vmatpush.bf16.msra.mxu1 %v657_v52  ;;  %v553_v59 = vpop.permute.xlu1 %552 }
  0xa3   : > { %748 = vmatpush.bf16.msra.mxu2 %v658_v53  ;;  %767 = vmatpush.bf16.msra.mxu3 %v659_v57  ;;  %v469_v60 = vpop.permute.xlu0 %468  ;;  %v588_v61 = vadd.f32 %v553_v59, %v508_v54  ;;  %v589_v62 = vadd.f32 %v553_v59, %v509_v55  ;;  %v590_v63 = vadd.f32 %v553_v59, %v510_v56 }
  0xa4   : > { %v512_v0 = vmul.f32 %v1965_v48, %v469_v60  ;;  %v513_v1 = vmul.f32 %v1967_v49, %v469_v60  ;;  %v514_v2 = vmul.f32 %v1969_v50, %v469_v60  ;;  %v515_v3 = vmul.f32 %v1971_v51, %v469_v60  ;;  %v543_v28 = vpop.permute.xlu2 %542 }
  0xa5   : > { %v591_v5 = vadd.f32 %v553_v59, %v511_v58  ;;  %v620_v10 = vmax.f32 %v588_v61, 0.0  ;;  %v621_v11 = vmax.f32 %v589_v62, 0.0  ;;  %v622_v12 = vmax.f32 %v590_v63, 0.0 }
  0xa6   : > { %v592_v6 = vadd.f32 %v558_v4, %v512_v0  ;;  %v593_v7 = vadd.f32 %v558_v4, %v513_v1  ;;  %v594_v8 = vadd.f32 %v558_v4, %v514_v2  ;;  %v595_v9 = vadd.f32 %v558_v4, %v515_v3 }
  0xa7   : > { %v623_v13 = vmax.f32 %v591_v5, 0.0 }
  0xa8   : > { %v624_v14 = vmax.f32 %v592_v6, 0.0  ;;  %v625_v15 = vmax.f32 %v593_v7, 0.0  ;;  %v626_v16 = vmax.f32 %v594_v8, 0.0  ;;  %v627_v17 = vmax.f32 %v595_v9, 0.0 }
  0xaa   : > { %v652_v18 = vpack.c.bf16 %v624_v14, %v620_v10  ;;  %v653_v19 = vpack.c.bf16 %v625_v15, %v621_v11  ;;  %v654_v20 = vpack.c.bf16 %v626_v16, %v622_v12  ;;  %v655_v21 = vpack.c.bf16 %v627_v17, %v623_v13  ;;  %v459_v27 = vpop.permute.xlu1 %458 }
  0xab   : > { %v454_v22 = vpop.permute.xlu0 %453  ;;  %v504_v33 = vmul.f32 %v1965_v48, %v459_v27  ;;  %v505_v34 = vmul.f32 %v1967_v49, %v459_v27  ;;  %v506_v35 = vmul.f32 %v1969_v50, %v459_v27  ;;  %v507_v36 = vmul.f32 %v1971_v51, %v459_v27 }
  0xac   : > { %v500_v23 = vmul.f32 %v1965_v48, %v454_v22  ;;  %711 = vmatpush.bf16.msra.mxu0 %v652_v18  ;;  %v501_v24 = vmul.f32 %v1967_v49, %v454_v22  ;;  %v502_v25 = vmul.f32 %v1969_v50, %v454_v22  ;;  %v503_v26 = vmul.f32 %v1971_v51, %v454_v22  ;;  %v1593_v50 = vld [vmem:[%s2219_s3] sm:$0xff]  ;;  %v1594_v51 = vld [vmem:[%s2219_s3 + $0x8] sm:$0xff]  ;;  %v686_v3 = vpop.permute.xlu2 %685 }
  0xad   : > { %730 = vmatpush.bf16.msra.mxu1 %v653_v19  ;;  %749 = vmatpush.bf16.msra.mxu2 %v654_v20 }
  0xae   : > { %768 = vmatpush.bf16.msra.mxu3 %v655_v21  ;;  %v580_v29 = vadd.f32 %v543_v28, %v500_v23  ;;  %v581_v30 = vadd.f32 %v543_v28, %v501_v24  ;;  %v582_v31 = vadd.f32 %v543_v28, %v502_v25  ;;  %v583_v32 = vadd.f32 %v543_v28, %v503_v26 }
  0xb0   : > { %v612_v42 = vmax.f32 %v580_v29, 0.0  ;;  %v613_v43 = vmax.f32 %v581_v30, 0.0  ;;  %v614_v44 = vmax.f32 %v582_v31, 0.0  ;;  %v615_v45 = vmax.f32 %v583_v32, 0.0 }
  0xb2   : > { %v681_v62 = vpop.permute.xlu1 %680 }
  0xb3   : > { %v548_v37 = vpop.permute.xlu0 %547 }
  0xb4   : > { %v584_v38 = vadd.f32 %v548_v37, %v504_v33  ;;  %v585_v39 = vadd.f32 %v548_v37, %v505_v34  ;;  %v586_v40 = vadd.f32 %v548_v37, %v506_v35  ;;  %v587_v41 = vadd.f32 %v548_v37, %v507_v36 }
  0xb6   : > { %v616_v46 = vmax.f32 %v584_v38, 0.0  ;;  %v617_v47 = vmax.f32 %v585_v39, 0.0  ;;  %v618_v52 = vmax.f32 %v586_v40, 0.0  ;;  %v619_v53 = vmax.f32 %v587_v41, 0.0 }
  0xb8   : > { %v648_v48 = vpack.c.bf16 %v616_v46, %v612_v42  ;;  %v649_v54 = vpack.c.bf16 %v617_v47, %v613_v43  ;;  %v650_v49 = vpack.c.bf16 %v618_v52, %v614_v44  ;;  %v651_v55 = vpack.c.bf16 %v619_v53, %v615_v45  ;;  %v1595_v44 = vld [vmem:[%s2221_s5] sm:$0xff] }
  0xba   : > { %712 = vmatpush.bf16.msra.mxu0 %v648_v48  ;;  %731 = vmatpush.bf16.msra.mxu1 %v649_v54  ;;  %v676_v4 = vpop.permute.xlu1 %675 }
  0xbb   : > { %750 = vmatpush.bf16.msra.mxu2 %v650_v49  ;;  %769 = vmatpush.bf16.msra.mxu3 %v651_v55  ;;  %v671_v11 = vpop.permute.xlu0 %670 }
  0xbd   : > { %1525 = vmatmul.msk.bf16.vlgmr.msra.gmra.mxu0 %vm698_vm0, %v1593_v50  ;;  %1527 = vmatmul.msk.bf16.vlgmr.msra.gmra.mxu1 %vm698_vm0, %v1593_v50 }
  0xbe   : > { %1529 = vmatmul.msk.bf16.vlgmr.msra.gmra.mxu2 %vm698_vm0, %v1593_v50  ;;  %1531 = vmatmul.msk.bf16.vlgmr.msra.gmra.mxu3 %vm698_vm0, %v1593_v50 }
  0xcd   : > { %1526 = vmatmul.msk.bf16.gmra.mxu0 %vm698_vm0, %v1594_v51  ;;  %1528 = vmatmul.msk.bf16.gmra.mxu1 %vm698_vm0, %v1594_v51 }
  0xce   : > { %1530 = vmatmul.msk.bf16.gmra.mxu2 %vm698_vm0, %v1594_v51  ;;  %1532 = vmatmul.msk.bf16.gmra.mxu3 %vm698_vm0, %v1594_v51  ;;  %v812_v51 = vpop.permute.xlu2 %811 }
 0x13a   : > { %v714_v56 = vpop.f32.mrf.mxu0  ;;  %v733_v57 = vpop.f32.mrf.mxu1 }
 0x13b   : > { %v715_v16 = vadd.f32 %v714_v56, %v671_v11  ;;  %v734_v17 = vadd.f32 %v733_v57, %v671_v11  ;;  %v817_v56 = vpop.permute.xlu0 %816 }
 0x13d   : > { %v781_v28 = vmax.f32 %v715_v16, 0.0  ;;  %v782_v29 = vmax.f32 %v734_v17, 0.0 }
 0x141   : > { %v752_v58 = vpop.f32.mrf.mxu2  ;;  %v771_v59 = vpop.f32.mrf.mxu3 }
 0x142   : > { %v716_v60 = vpop.f32.mrf.mxu0  ;;  %v735_v61 = vpop.f32.mrf.mxu1  ;;  %v753_v36 = vadd.f32 %v752_v58, %v671_v11  ;;  %v772_v37 = vadd.f32 %v771_v59, %v671_v11 }
 0x143   : > { %v717_v12 = vadd.f32 %v716_v60, %v676_v4  ;;  %v736_v13 = vadd.f32 %v735_v61, %v676_v4 }
 0x144   : > { %v783_v53 = vmax.f32 %v753_v36, 0.0  ;;  %v784_v48 = vmax.f32 %v772_v37, 0.0  ;;  %v907_v36 = vpop.permute.xlu0 %906 }
 0x145   : > { %v785_v22 = vmax.f32 %v717_v12, 0.0  ;;  %v786_v23 = vmax.f32 %v736_v13, 0.0 }
 0x147   : > { %v799_v38 = vpack.c.bf16 %v785_v22, %v781_v28  ;;  %v800_v39 = vpack.c.bf16 %v786_v23, %v782_v29 }
 0x149   : > { %v754_v63 = vpop.f32.mrf.mxu2  ;;  %v773_v0 = vpop.f32.mrf.mxu3 }
 0x14a   : > { %v719_v1 = vpop.f32.mrf.mxu0  ;;  %v738_v2 = vpop.f32.mrf.mxu1  ;;  %v755_v32 = vadd.f32 %v754_v63, %v676_v4  ;;  %v774_v33 = vadd.f32 %v773_v0, %v676_v4 }
 0x14b   : > { %v720_v5 = vadd.f32 %v719_v1, %v681_v62  ;;  %v739_v6 = vadd.f32 %v738_v2, %v681_v62 }
 0x14c   : > { %v787_v45 = vmax.f32 %v755_v32, 0.0  ;;  %v788_v46 = vmax.f32 %v774_v33, 0.0 }
 0x14d   : > { %v789_v18 = vmax.f32 %v720_v5, 0.0  ;;  %v790_v19 = vmax.f32 %v739_v6, 0.0 }
 0x14e   : > { %v801_v54 = vpack.c.bf16 %v787_v45, %v783_v53  ;;  %v802_v49 = vpack.c.bf16 %v788_v46, %v784_v48 }
 0x151   : > { %v757_v7 = vpop.f32.mrf.mxu2  ;;  %v776_v8 = vpop.f32.mrf.mxu3 }
 0x152   : > { %v721_v9 = vpop.f32.mrf.mxu0  ;;  %v740_v10 = vpop.f32.mrf.mxu1  ;;  %v758_v26 = vadd.f32 %v757_v7, %v681_v62  ;;  %v777_v27 = vadd.f32 %v776_v8, %v681_v62  ;;  %v1596_v7 = vld [vmem:[%s2223_s7] sm:$0xff] }
 0x153   : > { %v722_v14 = vadd.f32 %v721_v9, %v686_v3  ;;  %v741_v15 = vadd.f32 %v740_v10, %v686_v3 }
 0x154   : > { %v791_v40 = vmax.f32 %v758_v26, 0.0  ;;  %v792_v41 = vmax.f32 %v777_v27, 0.0 }
 0x155   : > { %v793_v20 = vmax.f32 %v722_v14, 0.0  ;;  %v794_v21 = vmax.f32 %v741_v15, 0.0 }
 0x157   : > { %v803_v24 = vpack.c.bf16 %v793_v20, %v789_v18  ;;  %v804_v25 = vpack.c.bf16 %v794_v21, %v790_v19  ;;  %v1597_v20 = vld [vmem:[%s2223_s7 + $0x8] sm:$0xff] }
 0x159   : > { %v759_v30 = vpop.f32.mrf.mxu2  ;;  %v778_v31 = vpop.f32.mrf.mxu3  ;;  %834 = vmatpush.bf16.msrb.mxu0 %v803_v24  ;;  %848 = vmatpush.bf16.msrb.mxu1 %v804_v25 }
 0x15a   : > { %v760_v34 = vadd.f32 %v759_v30, %v686_v3  ;;  %v779_v35 = vadd.f32 %v778_v31, %v686_v3  ;;  %v917_v25 = vpop.permute.xlu1 %916  ;;  %v922_v30 = vpop.permute.xlu2 %921 }
 0x15c   : > { %v795_v42 = vmax.f32 %v760_v34, 0.0  ;;  %v796_v43 = vmax.f32 %v779_v35, 0.0 }
 0x15d   : > { %835 = vmatpush.bf16.msrb.mxu0 %v799_v38  ;;  %849 = vmatpush.bf16.msrb.mxu1 %v800_v39 }
 0x15e   : > { %v805_v47 = vpack.c.bf16 %v795_v42, %v791_v40  ;;  %v806_v52 = vpack.c.bf16 %v796_v43, %v792_v41 }
 0x160   : > { %862 = vmatpush.bf16.msrb.mxu2 %v805_v47  ;;  %876 = vmatpush.bf16.msrb.mxu3 %v806_v52 }
 0x161   : > { %1537 = vmatmul.msk.bf16.vlgmr.msrb.gmra.mxu0 %vm824_vm1, %v1595_v44  ;;  %1538 = vmatmul.msk.bf16.vlgmr.msrb.gmra.mxu1 %vm824_vm1, %v1595_v44 }
 0x162   : > { %v912_v31 = vpop.permute.xlu1 %911 }
 0x164   : > { %863 = vmatpush.bf16.msrb.mxu2 %v801_v54  ;;  %877 = vmatpush.bf16.msrb.mxu3 %v802_v49 }
 0x167   : > { %1539 = vmatmul.msk.bf16.vlgmr.msrb.gmra.mxu2 %vm824_vm1, %v1595_v44  ;;  %1540 = vmatmul.msk.bf16.vlgmr.msrb.gmra.mxu3 %vm824_vm1, %v1595_v44 }
 0x1de   : > { %v837_v55 = vpop.f32.mrf.mxu0  ;;  %v851_v50 = vpop.f32.mrf.mxu1 }
 0x1df   : > { %v838_v57 = vadd.f32 %v837_v55, %v812_v51  ;;  %v852_v58 = vadd.f32 %v851_v50, %v812_v51 }
 0x1e1   : > { %v884_v63 = vmax.f32 %v838_v57, 0.0  ;;  %v885_v0 = vmax.f32 %v852_v58, 0.0 }
 0x1e6   : > { %v839_v59 = vpop.f32.mrf.mxu0  ;;  %v853_v60 = vpop.f32.mrf.mxu1 }
 0x1e7   : > { %v840_v61 = vadd.f32 %v839_v59, %v817_v56  ;;  %v854_v62 = vadd.f32 %v853_v60, %v817_v56  ;;  %v1598_v59 = vld [vmem:[%s2225_s9] sm:$0xff] }
 0x1e9   : > { %v888_v1 = vmax.f32 %v840_v61, 0.0  ;;  %v889_v2 = vmax.f32 %v854_v62, 0.0 }
 0x1ea   : > { %v865_v3 = vpop.f32.mrf.mxu2  ;;  %v879_v4 = vpop.f32.mrf.mxu3 }
 0x1eb   : > { %v896_v5 = vpack.c.bf16 %v888_v1, %v884_v63  ;;  %v897_v6 = vpack.c.bf16 %v889_v2, %v885_v0  ;;  %v866_v8 = vadd.f32 %v865_v3, %v812_v51  ;;  %v880_v9 = vadd.f32 %v879_v4, %v812_v51 }
 0x1ed   : > { %948 = vmatpush.bf16.msra.mxu0 %v896_v5  ;;  %967 = vmatpush.bf16.msra.mxu1 %v897_v6  ;;  %v886_v14 = vmax.f32 %v866_v8, 0.0  ;;  %v887_v15 = vmax.f32 %v880_v9, 0.0 }
 0x1f0   : > { %1549 = vmatmul.msk.bf16.vlgmr.msra.gmra.mxu0 %vm934_vm2, %v1596_v7  ;;  %1551 = vmatmul.msk.bf16.vlgmr.msra.gmra.mxu1 %vm934_vm2, %v1596_v7 }
 0x1f2   : > { %v867_v10 = vpop.f32.mrf.mxu2  ;;  %v881_v11 = vpop.f32.mrf.mxu3 }
 0x1f3   : > { %v868_v12 = vadd.f32 %v867_v10, %v817_v56  ;;  %v882_v13 = vadd.f32 %v881_v11, %v817_v56 }
 0x1f5   : > { %v890_v16 = vmax.f32 %v868_v12, 0.0  ;;  %v891_v17 = vmax.f32 %v882_v13, 0.0 }
 0x1f7   : > { %v898_v18 = vpack.c.bf16 %v890_v16, %v886_v14  ;;  %v899_v19 = vpack.c.bf16 %v891_v17, %v887_v15  ;;  %v1599_v16 = vld [vmem:[%s2225_s9 + $0x8] sm:$0xff] }
 0x1f9   : > { %986 = vmatpush.bf16.msra.mxu2 %v898_v18  ;;  %1005 = vmatpush.bf16.msra.mxu3 %v899_v19  ;;  %v1600_v19 = vld [vmem:[%s2225_s9 + $0x10] sm:$0xff] }
 0x1fc   : > { %1553 = vmatmul.msk.bf16.vlgmr.msra.gmra.mxu2 %vm934_vm2, %v1596_v7  ;;  %1555 = vmatmul.msk.bf16.vlgmr.msra.gmra.mxu3 %vm934_vm2, %v1596_v7 }
 0x200   : > { %1550 = vmatmul.msk.bf16.gmra.mxu0 %vm934_vm2, %v1597_v20  ;;  %1552 = vmatmul.msk.bf16.gmra.mxu1 %vm934_vm2, %v1597_v20 }
 0x20c   : > { %1554 = vmatmul.msk.bf16.gmra.mxu2 %vm934_vm2, %v1597_v20  ;;  %1556 = vmatmul.msk.bf16.gmra.mxu3 %vm934_vm2, %v1597_v20  ;;  %v1601_v20 = vld [vmem:[%s2225_s9 + $0x18] sm:$0xff] }
 0x26d   : > { %v950_v21 = vpop.f32.mrf.mxu0  ;;  %v969_v22 = vpop.f32.mrf.mxu1 }
 0x26e   : > { %v951_v41 = vadd.f32 %v950_v21, %v907_v36  ;;  %v970_v42 = vadd.f32 %v969_v22, %v907_v36 }
 0x270   : > { %v1017_v55 = vmax.f32 %v951_v41, 0.0  ;;  %v1018_v50 = vmax.f32 %v970_v42, 0.0 }
 0x275   : > { %v952_v23 = vpop.f32.mrf.mxu0  ;;  %v971_v24 = vpop.f32.mrf.mxu1 }
 0x276   : > { %v953_v37 = vadd.f32 %v952_v23, %v912_v31  ;;  %v972_v38 = vadd.f32 %v971_v24, %v912_v31 }
 0x278   : > { %v1021_v53 = vmax.f32 %v953_v37, 0.0  ;;  %v1022_v48 = vmax.f32 %v972_v38, 0.0 }
 0x27a   : > { %v1041_v51 = vpack.c.bf16 %v1021_v53, %v1017_v55  ;;  %v1042_v56 = vpack.c.bf16 %v1022_v48, %v1018_v50 }
 0x27d   : > { %v955_v26 = vpop.f32.mrf.mxu0  ;;  %v974_v27 = vpop.f32.mrf.mxu1 }
 0x27e   : > { %v956_v32 = vadd.f32 %v955_v26, %v917_v25  ;;  %v975_v33 = vadd.f32 %v974_v27, %v917_v25 }
 0x27f   : > { %v988_v28 = vpop.f32.mrf.mxu2  ;;  %v1007_v29 = vpop.f32.mrf.mxu3 }
 0x280   : > { %v1025_v45 = vmax.f32 %v956_v32, 0.0  ;;  %v1026_v46 = vmax.f32 %v975_v33, 0.0  ;;  %v989_v4 = vadd.f32 %v988_v28, %v907_v36  ;;  %v1008_v5 = vadd.f32 %v1007_v29, %v907_v36  ;;  %v2062_v28 = vpop.permute.xlu0 %1064  ;;  %v2064_v29 = vpop.permute.xlu1 %1069 }
 0x282   : > { %v1019_v14 = vmax.f32 %v989_v4, 0.0  ;;  %v1020_v15 = vmax.f32 %v1008_v5, 0.0 }
 0x285   : > { %v957_v34 = vpop.f32.mrf.mxu0  ;;  %v976_v35 = vpop.f32.mrf.mxu1 }
 0x286   : > { %v958_v39 = vadd.f32 %v957_v34, %v922_v30  ;;  %v977_v40 = vadd.f32 %v976_v35, %v922_v30 }
 0x287   : > { %v990_v43 = vpop.f32.mrf.mxu2  ;;  %v1009_v44 = vpop.f32.mrf.mxu3 }
 0x288   : > { %v1029_v47 = vmax.f32 %v958_v39, 0.0  ;;  %v1030_v52 = vmax.f32 %v977_v40, 0.0  ;;  %v991_v0 = vadd.f32 %v990_v43, %v912_v31  ;;  %v1010_v1 = vadd.f32 %v1009_v44, %v912_v31  ;;  %v2072_v35 = vpop.permute.xlu0 %1079  ;;  %v2074_v36 = vpop.permute.xlu1 %1287 }
 0x28a   : > { %v1045_v54 = vpack.c.bf16 %v1029_v47, %v1025_v45  ;;  %v1046_v49 = vpack.c.bf16 %v1030_v52, %v1026_v46  ;;  %v1023_v10 = vmax.f32 %v991_v0, 0.0  ;;  %v1024_v11 = vmax.f32 %v1010_v1, 0.0 }
 0x28c   : > { %1135 = vmatpush.bf16.msrb.mxu0 %v1045_v54  ;;  %1164 = vmatpush.bf16.msrb.mxu1 %v1046_v49  ;;  %v1043_v17 = vpack.c.bf16 %v1023_v10, %v1019_v14  ;;  %v1044_v18 = vpack.c.bf16 %v1024_v11, %v1020_v15 }
 0x28f   : > { %v993_v57 = vpop.f32.mrf.mxu2  ;;  %v1012_v58 = vpop.f32.mrf.mxu3 }
 0x290   : > { %1136 = vmatpush.bf16.msrb.mxu0 %v1041_v51  ;;  %1165 = vmatpush.bf16.msrb.mxu1 %v1042_v56  ;;  %v994_v60 = vadd.f32 %v993_v57, %v917_v25  ;;  %v1013_v61 = vadd.f32 %v1012_v58, %v917_v25  ;;  %v2060_v25 = vpop.permute.xlu2 %1059  ;;  %v2082_v42 = vpop.permute.xlu0 %1297 }
 0x291   : > { %v2088_v47 = vpop.permute.xlu1 %1084 }
 0x292   : > { %v1027_v6 = vmax.f32 %v994_v60, 0.0  ;;  %v1028_v7 = vmax.f32 %v1013_v61, 0.0 }
 0x293   : > { %1573 = vmatmul.msk.bf16.vlgmr.msrb.gmra.mxu0 %vm824_vm1, %v1598_v59  ;;  %1577 = vmatmul.msk.bf16.vlgmr.msrb.gmra.mxu1 %vm824_vm1, %v1598_v59 }
 0x297   : > { %v995_v62 = vpop.f32.mrf.mxu2  ;;  %v1014_v63 = vpop.f32.mrf.mxu3 }
 0x298   : > { %v996_v2 = vadd.f32 %v995_v62, %v922_v30  ;;  %v1015_v3 = vadd.f32 %v1014_v63, %v922_v30  ;;  %v2066_v30 = vpop.permute.xlu2 %1074  ;;  %v2101_v58 = vpop.permute.xlu0 %1089 }
 0x299   : > { %v2106_v1 = vpop.permute.xlu1 %1307 }
 0x29a   : > { %v1031_v8 = vmax.f32 %v996_v2, 0.0  ;;  %v1032_v9 = vmax.f32 %v1015_v3, 0.0 }
 0x29c   : > { %v1047_v12 = vpack.c.bf16 %v1031_v8, %v1027_v6  ;;  %v1048_v13 = vpack.c.bf16 %v1032_v9, %v1028_v7 }
 0x29e   : > { %1193 = vmatpush.bf16.msrb.mxu2 %v1047_v12  ;;  %1222 = vmatpush.bf16.msrb.mxu3 %v1048_v13 }
 0x2a0   : > { %v2080_v41 = vpop.permute.xlu2 %1292 }
 0x2a2   : > { %1194 = vmatpush.bf16.msrb.mxu2 %v1043_v17  ;;  %1223 = vmatpush.bf16.msrb.mxu3 %v1044_v18 }
 0x2a3   : > { %1574 = vmatmul.msk.bf16.gmra.mxu0 %vm824_vm1, %v1599_v16  ;;  %1578 = vmatmul.msk.bf16.gmra.mxu1 %vm824_vm1, %v1599_v16 }
 0x2a5   : > { %1581 = vmatmul.msk.bf16.vlgmr.msrb.gmra.mxu2 %vm824_vm1, %v1598_v59  ;;  %1585 = vmatmul.msk.bf16.vlgmr.msrb.gmra.mxu3 %vm824_vm1, %v1598_v59 }
 0x2a8   : > { %v2090_v52 = vpop.permute.xlu2 %1302 }
 0x2b0   : > { %v2110_v6 = vpop.permute.xlu2 %1094 }
 0x2b3   : > { %1575 = vmatmul.msk.bf16.gmra.mxu0 %vm824_vm1, %v1600_v19  ;;  %1579 = vmatmul.msk.bf16.gmra.mxu1 %vm824_vm1, %v1600_v19 }
 0x2b5   : > { %1582 = vmatmul.msk.bf16.gmra.mxu2 %vm824_vm1, %v1599_v16  ;;  %1586 = vmatmul.msk.bf16.gmra.mxu3 %vm824_vm1, %v1599_v16 }
 0x2c3   : > { %1576 = vmatmul.msk.bf16.gmra.mxu0 %vm824_vm1, %v1601_v20  ;;  %1580 = vmatmul.msk.bf16.gmra.mxu1 %vm824_vm1, %v1601_v20 }
 0x2c5   : > { %1583 = vmatmul.msk.bf16.gmra.mxu2 %vm824_vm1, %v1600_v19  ;;  %1587 = vmatmul.msk.bf16.gmra.mxu3 %vm824_vm1, %v1600_v19 }
 0x2d5   : > { %1584 = vmatmul.msk.bf16.gmra.mxu2 %vm824_vm1, %v1601_v20  ;;  %1588 = vmatmul.msk.bf16.gmra.mxu3 %vm824_vm1, %v1601_v20 }
 0x310   : > { %v1138_v21 = vpop.f32.mrf.mxu0  ;;  %v1167_v22 = vpop.f32.mrf.mxu1 }
 0x311   : > { %v1168_v48 = vadd.f32 %v1167_v22, %v2060_v25  ;;  %v1139_v59 = vadd.f32 %v1138_v21, %v2060_v25 }
 0x313   : > { %v1246_v60 = vmax.f32 %v1168_v48, 0.0  ;;  %v1245_v7 = vmax.f32 %v1139_v59, 0.0  ;;  %v2132_v59 = vpop.permute.xlu1 %1317 }
 0x315   : > { %v1326_v8 = vmul.f32 %v2074_v36, %v1246_v60 }
 0x318   : > { %v1140_v23 = vpop.f32.mrf.mxu0  ;;  %v1169_v24 = vpop.f32.mrf.mxu1 }
 0x319   : > { %v1170_v53 = vadd.f32 %v1169_v24, %v2062_v28  ;;  %v1141_v49 = vadd.f32 %v1140_v23, %v2062_v28  ;;  %v1325_v23 = vmul.f32 %v2074_v36, %v1245_v7 }
 0x31b   : > { %v1250_v50 = vmax.f32 %v1170_v53, 0.0  ;;  %v1249_v2 = vmax.f32 %v1141_v49, 0.0 }
 0x31d   : > { %v1330_v3 = vmul.f32 %v2080_v41, %v1250_v50  ;;  %v1329_v14 = vmul.f32 %v2080_v41, %v1249_v2 }
 0x31f   : > { %v1370_v17 = vadd.f32 %v1330_v3, %v1326_v8  ;;  %v2141_v3 = vpop.permute.xlu2 %1322 }
 0x320   : > { %v1143_v26 = vpop.f32.mrf.mxu0  ;;  %v1172_v27 = vpop.f32.mrf.mxu1 }
 0x321   : > { %v1173_v54 = vadd.f32 %v1172_v27, %v2064_v29  ;;  %v1144_v62 = vadd.f32 %v1143_v26, %v2064_v29 }
 0x323   : > { %v1254_v63 = vmax.f32 %v1173_v54, 0.0  ;;  %v1253_v10 = vmax.f32 %v1144_v62, 0.0 }
 0x325   : > { %v1334_v11 = vmul.f32 %v2082_v42, %v1254_v63  ;;  %v1333_v27 = vmul.f32 %v2082_v42, %v1253_v10 }
 0x328   : > { %v1145_v31 = vpop.f32.mrf.mxu0  ;;  %v1174_v32 = vpop.f32.mrf.mxu1 }
 0x329   : > { %v2068_v33 = vpop.f32.mrf.mxu2  ;;  %v2070_v34 = vpop.f32.mrf.mxu3  ;;  %v1175_v51 = vadd.f32 %v1174_v32, %v2066_v30  ;;  %v1146_v9 = vadd.f32 %v1145_v31, %v2066_v30  ;;  %v1371_v31 = vadd.f32 %v1370_v17, %v1334_v11 }
 0x32a   : > { %v1197_v53 = vadd.f32 %v2068_v33, %v2060_v25  ;;  %v1226_v48 = vadd.f32 %v2070_v34, %v2060_v25 }
 0x32b   : > { %v1258_v4 = vmax.f32 %v1175_v51, 0.0  ;;  %v1257_v24 = vmax.f32 %v1146_v9, 0.0 }
 0x32c   : > { %v1248_v7 = vmax.f32 %v1226_v48, 0.0 }
 0x32d   : > { %v1338_v18 = vmul.f32 %v2090_v52, %v1258_v4  ;;  %v1337_v60 = vmul.f32 %v2090_v52, %v1257_v24 }
 0x330   : > { %v1148_v37 = vpop.f32.mrf.mxu0  ;;  %v1177_v38 = vpop.f32.mrf.mxu1 }
 0x331   : > { %v2076_v39 = vpop.f32.mrf.mxu2  ;;  %v2078_v40 = vpop.f32.mrf.mxu3  ;;  %v1178_v0 = vadd.f32 %v1177_v38, %v2072_v35  ;;  %v1149_v15 = vadd.f32 %v1148_v37, %v2072_v35 }
 0x332   : > { %v2124_v38 = vpop.permute.xlu0 %1312  ;;  %v1199_v62 = vadd.f32 %v2076_v39, %v2062_v28  ;;  %v1228_v33 = vadd.f32 %v2078_v40, %v2062_v28 }
 0x333   : > { %v1262_v12 = vmax.f32 %v1178_v0, 0.0  ;;  %v1261_v54 = vmax.f32 %v1149_v15, 0.0 }
 0x335   : > { %v1342_v32 = vmul.f32 %v2106_v1, %v1262_v12  ;;  %v1341_v4 = vmul.f32 %v2106_v1, %v1261_v54  ;;  %v1251_v12 = vmax.f32 %v1199_v62, 0.0 }
 0x338   : > { %v1150_v43 = vpop.f32.mrf.mxu0  ;;  %v1179_v44 = vpop.f32.mrf.mxu1 }
 0x339   : > { %v2084_v45 = vpop.f32.mrf.mxu2  ;;  %v2086_v46 = vpop.f32.mrf.mxu3  ;;  %v1180_v5 = vadd.f32 %v1179_v44, %v2088_v47  ;;  %v1151_v26 = vadd.f32 %v1150_v43, %v2088_v47  ;;  %v1357_v44 = vadd.f32 %v1329_v14, %v1325_v23 }
 0x33a   : > { %v1231_v39 = vadd.f32 %v2086_v46, %v2064_v29 }
 0x33b   : > { %v1266_v19 = vmax.f32 %v1180_v5, 0.0  ;;  %v1265_v63 = vmax.f32 %v1151_v26, 0.0  ;;  %v1358_v25 = vadd.f32 %v1357_v44, %v1333_v27  ;;  %v1202_v5 = vadd.f32 %v2084_v45, %v2064_v29 }
 0x33c   : > { %v1328_v27 = vmul.f32 %v2074_v36, %v1248_v7 }
 0x33d   : > { %v1346_v43 = vmul.f32 %v2124_v38, %v1266_v19  ;;  %v1359_v11 = vadd.f32 %v1358_v25, %v1337_v60  ;;  %v1345_v14 = vmul.f32 %v2124_v38, %v1265_v63  ;;  %v1255_v17 = vmax.f32 %v1202_v5, 0.0 }
 0x33f   : > { %v1360_v46 = vadd.f32 %v1359_v11, %v1341_v4  ;;  %v1335_v44 = vmul.f32 %v2082_v42, %v1255_v17 }
 0x340   : > { %v1182_v55 = vpop.f32.mrf.mxu1  ;;  %v1153_v61 = vpop.f32.mrf.mxu0 }
 0x341   : > { %v2097_v56 = vpop.f32.mrf.mxu2  ;;  %v2099_v57 = vpop.f32.mrf.mxu3  ;;  %v1183_v13 = vadd.f32 %v1182_v55, %v2101_v58  ;;  %v1372_v55 = vadd.f32 %v1371_v31, %v1338_v18  ;;  %v1154_v50 = vadd.f32 %v1153_v61, %v2101_v58  ;;  %v1247_v61 = vmax.f32 %v1197_v53, 0.0 }
 0x342   : > { %v1233_v45 = vadd.f32 %v2099_v57, %v2066_v30  ;;  %v1256_v18 = vmax.f32 %v1231_v39, 0.0 }
 0x343   : > { %v1270_v37 = vmax.f32 %v1183_v13, 0.0  ;;  %v1373_v34 = vadd.f32 %v1372_v55, %v1342_v32  ;;  %v1269_v40 = vmax.f32 %v1154_v50, 0.0  ;;  %v1252_v13 = vmax.f32 %v1228_v33, 0.0 }
 0x344   : > { %v1327_v26 = vmul.f32 %v2074_v36, %v1247_v61  ;;  %v1260_v32 = vmax.f32 %v1233_v45, 0.0  ;;  %v1336_v53 = vmul.f32 %v2082_v42, %v1256_v18 }
 0x345   : > { %v1350_v0 = vmul.f32 %v2132_v59, %v1270_v37  ;;  %v1374_v28 = vadd.f32 %v1373_v34, %v1346_v43  ;;  %v1349_v19 = vmul.f32 %v2132_v59, %v1269_v40  ;;  %v1332_v31 = vmul.f32 %v2080_v41, %v1252_v13 }
 0x346   : > { %v1340_v42 = vmul.f32 %v2090_v52, %v1260_v32 }
 0x347   : > { %v1375_v15 = vadd.f32 %v1374_v28, %v1350_v0 }
 0x348   : > { %v1184_v16 = vpop.f32.mrf.mxu1  ;;  %v1155_v49 = vpop.f32.mrf.mxu0 }
 0x349   : > { %v1185_v20 = vadd.f32 %v1184_v16, %v2110_v6  ;;  %v1206_v21 = vpop.f32.mrf.mxu2  ;;  %v1235_v22 = vpop.f32.mrf.mxu3  ;;  %v1156_v2 = vadd.f32 %v1155_v49, %v2110_v6  ;;  %v1204_v16 = vadd.f32 %v2097_v56, %v2066_v30  ;;  %v1331_v56 = vmul.f32 %v2080_v41, %v1251_v12 }
 0x34a   : > { %v1207_v23 = vadd.f32 %v1206_v21, %v2072_v35  ;;  %v1236_v24 = vadd.f32 %v1235_v22, %v2072_v35  ;;  %v1361_v30 = vadd.f32 %v1360_v46, %v1345_v14 }
 0x34b   : > { %v1274_v51 = vmax.f32 %v1185_v20, 0.0  ;;  %v1273_v29 = vmax.f32 %v1156_v2, 0.0  ;;  %v1259_v57 = vmax.f32 %v1204_v16, 0.0  ;;  %v1383_v41 = vadd.f32 %v1331_v56, %v1327_v26 }
 0x34c   : > { %v1362_v22 = vadd.f32 %v1361_v30, %v1349_v19  ;;  %v1263_v36 = vmax.f32 %v1207_v23, 0.0  ;;  %v1264_v54 = vmax.f32 %v1236_v24, 0.0  ;;  %v1413_v30 = vpop.permute.xlu0 %1412 }
 0x34d   : > { %v1354_v8 = vmul.f32 %v2141_v3, %v1274_v51  ;;  %v1353_v37 = vmul.f32 %v2141_v3, %v1273_v29  ;;  %v1396_v51 = vadd.f32 %v1332_v31, %v1328_v27  ;;  %v1339_v60 = vmul.f32 %v2090_v52, %v1259_v57 }
 0x34e   : > { %v1384_v33 = vadd.f32 %v1383_v41, %v1335_v44  ;;  %v1343_v0 = vmul.f32 %v2106_v1, %v1263_v36  ;;  %v1344_v2 = vmul.f32 %v2106_v1, %v1264_v54  ;;  %v1415_v44 = vperm.slane %v1413_v30, 0 }
 0x34f   : > { %v1376_v20 = vadd.f32 %v1375_v15, %v1354_v8  ;;  %v1363_v62 = vadd.f32 %v1362_v22, %v1353_v37  ;;  %v1397_v25 = vadd.f32 %v1396_v51, %v1336_v53 }
 0x350   : > { %v1385_v5 = vadd.f32 %v1384_v33, %v1339_v60 }
 0x351   : > { %v1208_v9 = vpop.f32.mrf.mxu2  ;;  %v1237_v10 = vpop.f32.mrf.mxu3  ;;  %v1377_v48 = vrot.slane %v1376_v20, 4  ;;  %v1398_v39 = vadd.f32 %v1397_v25, %v1340_v42 }
 0x352   : > { %v1209_v21 = vadd.f32 %v1208_v9, %v2088_v47  ;;  %v1238_v35 = vadd.f32 %v1237_v10, %v2088_v47  ;;  %v1386_v40 = vadd.f32 %v1385_v5, %v1343_v0 }
 0x353   : > { %v1378_v34 = vadd.f32 %v1377_v48, %v1376_v20  ;;  %v1399_v8 = vadd.f32 %v1398_v39, %v1344_v2 }
 0x354   : > { %v1267_v63 = vmax.f32 %v1209_v21, 0.0  ;;  %v1268_v47 = vmax.f32 %v1238_v35, 0.0 }
 0x355   : > { %v1379_v52 = vrot.slane %v1378_v34, 2 }
 0x356   : > { %v1347_v7 = vmul.f32 %v2124_v38, %v1267_v63  ;;  %v1348_v28 = vmul.f32 %v2124_v38, %v1268_v47 }
 0x357   : > { %v1380_v46 = vadd.f32 %v1379_v52, %v1378_v34 }
 0x358   : > { %v1387_v15 = vadd.f32 %v1386_v40, %v1347_v7  ;;  %v1400_v16 = vadd.f32 %v1399_v8, %v1348_v28 }
 0x359   : > { %v1211_v49 = vpop.f32.mrf.mxu2  ;;  %v1240_v55 = vpop.f32.mrf.mxu3  ;;  %v1381_v24 = vrot.slane %v1380_v46, 1 }
 0x35a   : > { %v1212_v43 = vadd.f32 %v1211_v49, %v2101_v58  ;;  %v1241_v50 = vadd.f32 %v1240_v55, %v2101_v58  ;;  %v1364_v58 = vrot.slane %v1363_v62, 4  ;;  %v1434_v55 = vlaneseq }
 0x35b   : > { %v1382_v57 = vadd.f32 %v1381_v24, %v1380_v46 }
 0x35c   : > { %v1271_v61 = vmax.f32 %v1212_v43, 0.0  ;;  %v1272_v4 = vmax.f32 %v1241_v50, 0.0  ;;  %v1365_v14 = vadd.f32 %v1364_v58, %v1363_v62  ;;  %vm1436_vm6 = vcmp.lt.s32.totalorder %v1434_v55, 512 }
 0x35d   : > { %v1417_v48 = vadd.f32 %v1415_v44, %v1382_v57 }
 0x35e   : > { %v1351_v11 = vmul.f32 %v2132_v59, %v1271_v61  ;;  %v1352_v12 = vmul.f32 %v2132_v59, %v1272_v4  ;;  %v1366_v20 = vrot.slane %v1365_v14, 2 }
 0x35f   : > { %v1424_v50 = vrot.slane %v1417_v48, 7 }
 0x360   : > { %v1388_v38 = vadd.f32 %v1387_v15, %v1351_v11  ;;  %v1401_v17 = vadd.f32 %v1400_v16, %v1352_v12  ;;  %v1367_v27 = vadd.f32 %v1366_v20, %v1365_v14 }
 0x361   : > { %v1213_v9 = vpop.f32.mrf.mxu2  ;;  %v1242_v10 = vpop.f32.mrf.mxu3 }
 0x362   : > { %v1214_v1 = vadd.f32 %v1213_v9, %v2110_v6  ;;  %v1243_v13 = vadd.f32 %v1242_v10, %v2110_v6  ;;  %v1368_v53 = vrot.slane %v1367_v27, 1 }
 0x364   : > { %v1275_v45 = vmax.f32 %v1214_v1, 0.0  ;;  %v1276_v29 = vmax.f32 %v1243_v13, 0.0  ;;  %v1369_v36 = vadd.f32 %v1368_v53, %v1367_v27 }
 0x366   : > { %v1355_v18 = vmul.f32 %v2141_v3, %v1275_v45  ;;  %v1356_v19 = vmul.f32 %v2141_v3, %v1276_v29  ;;  %v1416_v51 = vadd.f32 %v1415_v44, %v1369_v36 }
 0x368   : > { %v1389_v23 = vadd.f32 %v1388_v38, %v1355_v18  ;;  %v1402_v59 = vadd.f32 %v1401_v17, %v1356_v19  ;;  %v1428_v62 = vsel %vm1427_vm3, %v1416_v51, %v1424_v50 }
 0x36a   : > { %v1390_v26 = vrot.slane %v1389_v23, 4  ;;  %v1403_v6 = vrot.slane %v1402_v59, 4 }
 0x36c   : > { %v1391_v56 = vadd.f32 %v1390_v26, %v1389_v23  ;;  %v1404_v31 = vadd.f32 %v1403_v6, %v1402_v59 }
 0x36e   : > { %v1392_v32 = vrot.slane %v1391_v56, 2  ;;  %v1405_v37 = vrot.slane %v1404_v31, 2 }
 0x370   : > { %v1393_v21 = vadd.f32 %v1392_v32, %v1391_v56  ;;  %v1406_v3 = vadd.f32 %v1405_v37, %v1404_v31 }
 0x372   : > { %v1394_v35 = vrot.slane %v1393_v21, 1  ;;  %v1407_v22 = vrot.slane %v1406_v3, 1 }
 0x374   : > { %v1395_v54 = vadd.f32 %v1394_v35, %v1393_v21  ;;  %v1408_v49 = vadd.f32 %v1407_v22, %v1406_v3 }
 0x376   : > { %v1418_v41 = vadd.f32 %v1415_v44, %v1395_v54  ;;  %v1419_v43 = vadd.f32 %v1415_v44, %v1408_v49 }
 0x378   : > { %v1425_v60 = vrot.slane %v1418_v41, 6  ;;  %v1426_v42 = vrot.slane %v1419_v43, 5 }
 0x37a   : > { %v1430_v33 = vsel %vm1429_vm4, %v1425_v60, %v1426_v42 }
 0x37b   : > { %v1432_v63 = vsel %vm1431_vm5, %v1428_v62, %v1430_v33 }
 0x37c   : > { %1438 = vst.msk [vmem:[%s434_s24] sm:$0xf] %vm1436_vm6, %v1432_v63 }
 0x37d   : > { %1672 = shalt.err (!%p1669_p3)
}
 0x37e   : > { %1602 = dma.vmem_to_hbm [thread:$0]  (%p1820_p5), %s1453_s25, 64, %s1455_s12, %s1440_s21  }
 0x37f PF: > { %p1608_p4 = scmp.ge.s32.totalorder %s1707_s30, 2  ;;  %s1466_s16 = sand.u32 1, %s1695_s27  }
 0x380   : > { %s1467_s24 = scalar_lea.sflag [#allocation4], %s1466_s16 }
 0x381   : > { %p1605_p7 = pnand %p1608_p4, %p1824_p6 }
 0x383   : > { %p1606_p8 = pneg %p1605_p7 }
 0x385   : > { %1690 = dma.done.wait (%p1606_p8), %s1467_s24, 64  }
 0x386   : > { %1692 = vsyncadd (%p1606_p8), %s1467_s24, 4294967232  ;;  %p25_p9 = scmp.ge.s32.totalorder %s1806_s15, 4   ;;  %s2238_s27 = smov %s1699_s28 }
 0x387   : > { %s2239_s28 = smov %s1703_s29  ;;  %s2240_s29 = smov %s1818_s18 }
 0x388   : > { %s2241_s30 = smov %s1806_s15  ;;  %27 = sbr.rel (!%p25_p9) target bundleno = 6 (0x6), region = 107 }
 0x38d   :  { %1473 = vsyncpa [#allocation4], 1 }
 0x38e   :  { %1475 = vsyncpa [#allocation4 + $0x1], 1 }

</bundles_post_ra>
